<compile_context>
chip_gen: v6e
topology: v6e:2x2x1
jax: 0.10.0
libtpu: 0.0.40
codegen_flags: <defaults>
</compile_context>

<pallas_src>
import jax
import jax.numpy as jnp
from jax.experimental import pallas as pl
from jax.experimental.pallas import tpu as pltpu

INPUT_SIZE = 242
L1_SIZE = 121
L2_SIZE = 27
L3_SIZE = 7
OUTPUT = 2

# Lane/sublane-friendly padded widths.
H1_PAD = 128   # 121 -> 128
H2_PAD = 32    # 27  -> 32
H3_PAD = 8     # 7   -> 8
OUT_PAD = 128  # 2   -> 128  (lane-dense output slab, sliced in the wrapper)


def _round_up(n, m):
    return ((n + m - 1) // m) * m


def _mlp_kernel(x_ref,
                w1_ref, b1_ref,
                w2_ref, b2_ref,
                w3_ref, b3_ref,
                w4_ref, b4_ref,
                o_ref):
    # x tile: (TB, 242) f32 -> bf16 for the MXU (f32 accumulation everywhere).
    x = x_ref[...].astype(jnp.bfloat16)

    # fc1 + relu  (TB, 242) @ (242, 128)
    h = jnp.dot(x, w1_ref[...], preferred_element_type=jnp.float32) + b1_ref[...]
    h = jnp.maximum(h, 0.0)

    # fc2 + relu  (TB, 128) @ (128, 32)
    h = jnp.dot(h.astype(jnp.bfloat16), w2_ref[...],
                preferred_element_type=jnp.float32) + b2_ref[...]
    h = jnp.maximum(h, 0.0)

    # fc3 + relu  (TB, 32) @ (32, 8)
    h = jnp.dot(h.astype(jnp.bfloat16), w3_ref[...],
                preferred_element_type=jnp.float32) + b3_ref[...]
    h = jnp.maximum(h, 0.0)

    # fc4 (no activation)  (TB, 8) @ (8, 128); only the first 2 columns are real
    # logits, padded columns are exactly 0 (zero weights + zero bias).
    logits = jnp.dot(h.astype(jnp.bfloat16), w4_ref[...],
                     preferred_element_type=jnp.float32) + b4_ref[...]

    # log_softmax specialized to 2 classes: explicit lane slices, no 128-lane
    # cross-lane reductions (keeps the XLU free; exp/log go to the EUP).
    a = logits[:, 0:1]
    b = logits[:, 1:2]
    m = jnp.maximum(a, b)
    lse = m + jnp.log(jnp.exp(a - m) + jnp.exp(b - m))

    # Lane-dense, unmasked store of the full 128-wide slab; the wrapper slices
    # out columns [0, 2).  Padded columns hold -lse (finite, ignored).
    o_ref[...] = logits - lse


def net_forward(x, params, *, block_b=1024):
    """x: (B, 242) float32 (or bfloat16). Returns (B, 2) float32 log-probs."""
    (w1, b1), (w2, b2), (w3, b3), (w4, b4) = params
    B = x.shape[0]

    # Batch tile: multiple of 8 sublanes, capped by block_b (sweepable;
    # 1024 is comfortable for v7x's 64 MiB VMEM as well as v5e/v6e).
    TB = min(_round_up(block_b, 8), _round_up(B, 8))
    grid_b = pl.cdiv(B, TB)
    Bp = grid_b * TB
    if Bp != B:
        x = jnp.pad(x, ((0, Bp - B), (0, 0)))

    const = lambda i: (0, 0)       # resident weights / biases
    batch = lambda i: (i, 0)       # batch-tiled x / output

    in_specs = [
        pl.BlockSpec((TB, INPUT_SIZE), batch),
        pl.BlockSpec((INPUT_SIZE, H1_PAD), const),
        pl.BlockSpec((1, H1_PAD), const),
        pl.BlockSpec((H1_PAD, H2_PAD), const),
        pl.BlockSpec((1, H2_PAD), const),
        pl.BlockSpec((H2_PAD, H3_PAD), const),
        pl.BlockSpec((1, H3_PAD), const),
        pl.BlockSpec((H3_PAD, OUT_PAD), const),
        pl.BlockSpec((1, OUT_PAD), const),
    ]
    out_specs = pl.BlockSpec((TB, OUT_PAD), batch)

    param_bytes = sum(int(a.size) * a.dtype.itemsize
                      for a in (w1, b1, w2, b2, w3, b3, w4, b4))
    cost = pl.CostEstimate(
        flops=2 * Bp * (INPUT_SIZE * H1_PAD + H1_PAD * H2_PAD
                        + H2_PAD * H3_PAD + H3_PAD * OUT_PAD),
        transcendentals=3 * Bp,  # 2x exp + 1x log per row
        bytes_accessed=Bp * INPUT_SIZE * x.dtype.itemsize
                       + Bp * OUT_PAD * 4 + param_bytes,
    )

    out = pl.pallas_call(
        _mlp_kernel,
        out_shape=jax.ShapeDtypeStruct((Bp, OUT_PAD), jnp.float32),
        grid=(grid_b,),
        in_specs=in_specs,
        out_specs=out_specs,
        compiler_params=pltpu.CompilerParams(
            dimension_semantics=("parallel",)),
        cost_estimate=cost,
    )(x, w1, b1, w2, b2, w3, b3, w4, b4)

    # Slice the lane-dense slab back to the real (B, 2) log-probs.
    return out[:B, :OUTPUT]


def net_reference(x, params):
    """Pure-JAX reference with the same bf16-matmul numerics."""
    (w1, b1), (w2, b2), (w3, b3), (w4, b4) = params
    h = x.astype(jnp.bfloat16)
    h = jnp.maximum(jnp.dot(h, w1, preferred_element_type=jnp.float32) + b1, 0.0)
    h = jnp.maximum(jnp.dot(h.astype(jnp.bfloat16), w2,
                            preferred_element_type=jnp.float32) + b2, 0.0)
    h = jnp.maximum(jnp.dot(h.astype(jnp.bfloat16), w3,
                            preferred_element_type=jnp.float32) + b3, 0.0)
    logits = jnp.dot(h.astype(jnp.bfloat16), w4,
                     preferred_element_type=jnp.float32) + b4
    return jax.nn.log_softmax(logits[:, :OUTPUT], axis=-1)


def init_params(key):
    """nn.Linear-style init (uniform +/- 1/sqrt(fan_in)), zero-padded to the
    lane-friendly widths; weights stored in bfloat16, biases in float32."""
    dims = [
        (INPUT_SIZE, L1_SIZE, INPUT_SIZE, H1_PAD),
        (L1_SIZE, L2_SIZE, H1_PAD, H2_PAD),
        (L2_SIZE, L3_SIZE, H2_PAD, H3_PAD),
        (L3_SIZE, OUTPUT, H3_PAD, OUT_PAD),
    ]
    params = []
    for fan_in, fan_out, in_pad, out_pad in dims:
        key, kw, kb = jax.random.split(key, 3)
        bound = 1.0 / (fan_in ** 0.5)
        w = jax.random.uniform(kw, (fan_in, fan_out), jnp.float32, -bound, bound)
        b = jax.random.uniform(kb, (1, fan_out), jnp.float32, -bound, bound)
        w_p = jnp.zeros((in_pad, out_pad), jnp.float32).at[:fan_in, :fan_out].set(w)
        b_p = jnp.zeros((1, out_pad), jnp.float32).at[:, :fan_out].set(b)
        params.append((w_p.astype(jnp.bfloat16), b_p))
    return tuple(params)


if __name__ == "__main__":
    key = jax.random.PRNGKey(0)
    key, kx = jax.random.split(key)

    B = 8
    x = jax.random.normal(kx, (B, INPUT_SIZE), jnp.float32)
    params = init_params(key)

    out = jax.block_until_ready(net_forward(x, params))
    assert out.shape == (B, OUTPUT)
    # rows of log-probs must exp-sum to ~1
    assert jnp.allclose(jnp.sum(jnp.exp(out), axis=-1), 1.0, atol=1e-5)
    # match the pure-JAX reference (same bf16 matmul numerics)
    ref = net_reference(x, params)
    assert jnp.allclose(out, ref, atol=2e-2), float(jnp.max(jnp.abs(out - ref)))

    # exercise the multi-tile grid + tail-padding path
    B2 = 20
    x2 = jax.random.normal(jax.random.PRNGKey(1), (B2, INPUT_SIZE), jnp.float32)
    out2 = jax.block_until_ready(net_forward(x2, params, block_b=8))
    assert out2.shape == (B2, OUTPUT)
    assert jnp.allclose(jnp.sum(jnp.exp(out2), axis=-1), 1.0, atol=1e-5)
    assert jnp.allclose(out2, net_reference(x2, params), atol=2e-2)

    print("KERNEL_OK")
</pallas_src>

<mosaic_0001>
module attributes {stable_mosaic.version = 11 : i64} {
  func.func @_mlp_kernel(%arg0: i32, %arg1: memref<8x242xf32, #tpu.memory_space<vmem>>, %arg2: memref<242x128xbf16, #tpu.memory_space<vmem>>, %arg3: memref<1x128xf32, #tpu.memory_space<vmem>>, %arg4: memref<128x32xbf16, #tpu.memory_space<vmem>>, %arg5: memref<1x32xf32, #tpu.memory_space<vmem>>, %arg6: memref<32x8xbf16, #tpu.memory_space<vmem>>, %arg7: memref<1x8xf32, #tpu.memory_space<vmem>>, %arg8: memref<8x128xbf16, #tpu.memory_space<vmem>>, %arg9: memref<1x128xf32, #tpu.memory_space<vmem>>, %arg10: memref<8x128xf32, #tpu.memory_space<vmem>>) attributes {dimension_semantics = [#tpu.dimension_semantics<parallel>], iteration_bounds = array<i64: 1>, scalar_prefetch = 0 : i64, scratch_operands = 0 : i64, tpu.core_type = #tpu.core_type<tc>, window_params = [{transform_indices = @transform_0, window_bounds = array<i64: 8, 242>}, {pipeline_mode = #tpu.pipeline_mode<synchronous>, transform_indices = @transform_1, window_bounds = array<i64: 242, 128>}, {pipeline_mode = #tpu.pipeline_mode<synchronous>, transform_indices = @transform_2, window_bounds = array<i64: 1, 128>}, {pipeline_mode = #tpu.pipeline_mode<synchronous>, transform_indices = @transform_3, window_bounds = array<i64: 128, 32>}, {pipeline_mode = #tpu.pipeline_mode<synchronous>, transform_indices = @transform_4, window_bounds = array<i64: 1, 32>}, {pipeline_mode = #tpu.pipeline_mode<synchronous>, transform_indices = @transform_5, window_bounds = array<i64: 32, 8>}, {pipeline_mode = #tpu.pipeline_mode<synchronous>, transform_indices = @transform_6, window_bounds = array<i64: 1, 8>}, {pipeline_mode = #tpu.pipeline_mode<synchronous>, transform_indices = @transform_7, window_bounds = array<i64: 8, 128>}, {pipeline_mode = #tpu.pipeline_mode<synchronous>, transform_indices = @transform_8, window_bounds = array<i64: 1, 128>}, {transform_indices = @transform_9, window_bounds = array<i64: 8, 128>}]} {
    %c0 = arith.constant 0 : index
    %c0_0 = arith.constant 0 : index
    %0 = vector.load %arg1[%c0, %c0_0] : memref<8x242xf32, #tpu.memory_space<vmem>>, vector<8x242xf32>
    %1 = arith.truncf %0 : vector<8x242xf32> to vector<8x242xbf16>
    %c0_1 = arith.constant 0 : index
    %c0_2 = arith.constant 0 : index
    %2 = vector.load %arg2[%c0_1, %c0_2] : memref<242x128xbf16, #tpu.memory_space<vmem>>, vector<242x128xbf16>
    %cst = arith.constant dense<0.000000e+00> : vector<8x128xf32>
    %3 = tpu.matmul %1, %2, %cst {dimension_numbers = #tpu.dot_dimension_numbers<[1], [0], [0], [1], [0, 0, 1, 1], [], []>} : vector<8x242xbf16>, vector<242x128xbf16>, vector<8x128xf32> -> vector<8x128xf32>
    %c0_3 = arith.constant 0 : index
    %c0_4 = arith.constant 0 : index
    %4 = vector.load %arg3[%c0_3, %c0_4] : memref<1x128xf32, #tpu.memory_space<vmem>>, vector<1x128xf32>
    %5 = vector.broadcast %4 : vector<1x128xf32> to vector<8x128xf32>
    %6 = arith.addf %3, %5 : vector<8x128xf32>
    %cst_5 = arith.constant 0.000000e+00 : f32
    %7 = vector.broadcast %cst_5 : f32 to vector<8x128xf32>
    %8 = arith.maximumf %6, %7 : vector<8x128xf32>
    %9 = arith.truncf %8 : vector<8x128xf32> to vector<8x128xbf16>
    %c0_6 = arith.constant 0 : index
    %c0_7 = arith.constant 0 : index
    %10 = vector.load %arg4[%c0_6, %c0_7] : memref<128x32xbf16, #tpu.memory_space<vmem>>, vector<128x32xbf16>
    %cst_8 = arith.constant dense<0.000000e+00> : vector<8x32xf32>
    %11 = tpu.matmul %9, %10, %cst_8 {dimension_numbers = #tpu.dot_dimension_numbers<[1], [0], [0], [1], [0, 0, 1, 1], [], []>} : vector<8x128xbf16>, vector<128x32xbf16>, vector<8x32xf32> -> vector<8x32xf32>
    %c0_9 = arith.constant 0 : index
    %c0_10 = arith.constant 0 : index
    %12 = vector.load %arg5[%c0_9, %c0_10] : memref<1x32xf32, #tpu.memory_space<vmem>>, vector<1x32xf32>
    %13 = vector.broadcast %12 : vector<1x32xf32> to vector<8x32xf32>
    %14 = arith.addf %11, %13 : vector<8x32xf32>
    %cst_11 = arith.constant 0.000000e+00 : f32
    %15 = vector.broadcast %cst_11 : f32 to vector<8x32xf32>
    %16 = arith.maximumf %14, %15 : vector<8x32xf32>
    %17 = arith.truncf %16 : vector<8x32xf32> to vector<8x32xbf16>
    %c0_12 = arith.constant 0 : index
    %c0_13 = arith.constant 0 : index
    %18 = vector.load %arg6[%c0_12, %c0_13] : memref<32x8xbf16, #tpu.memory_space<vmem>>, vector<32x8xbf16>
    %cst_14 = arith.constant dense<0.000000e+00> : vector<8x8xf32>
    %19 = tpu.matmul %17, %18, %cst_14 {dimension_numbers = #tpu.dot_dimension_numbers<[1], [0], [0], [1], [0, 0, 1, 1], [], []>} : vector<8x32xbf16>, vector<32x8xbf16>, vector<8x8xf32> -> vector<8x8xf32>
    %c0_15 = arith.constant 0 : index
    %c0_16 = arith.constant 0 : index
    %20 = vector.load %arg7[%c0_15, %c0_16] : memref<1x8xf32, #tpu.memory_space<vmem>>, vector<1x8xf32>
    %21 = vector.broadcast %20 : vector<1x8xf32> to vector<8x8xf32>
    %22 = arith.addf %19, %21 : vector<8x8xf32>
    %cst_17 = arith.constant 0.000000e+00 : f32
    %23 = vector.broadcast %cst_17 : f32 to vector<8x8xf32>
    %24 = arith.maximumf %22, %23 : vector<8x8xf32>
    %25 = arith.truncf %24 : vector<8x8xf32> to vector<8x8xbf16>
    %c0_18 = arith.constant 0 : index
    %c0_19 = arith.constant 0 : index
    %26 = vector.load %arg8[%c0_18, %c0_19] : memref<8x128xbf16, #tpu.memory_space<vmem>>, vector<8x128xbf16>
    %cst_20 = arith.constant dense<0.000000e+00> : vector<8x128xf32>
    %27 = tpu.matmul %25, %26, %cst_20 {dimension_numbers = #tpu.dot_dimension_numbers<[1], [0], [0], [1], [0, 0, 1, 1], [], []>} : vector<8x8xbf16>, vector<8x128xbf16>, vector<8x128xf32> -> vector<8x128xf32>
    %c0_21 = arith.constant 0 : index
    %c0_22 = arith.constant 0 : index
    %28 = vector.load %arg9[%c0_21, %c0_22] : memref<1x128xf32, #tpu.memory_space<vmem>>, vector<1x128xf32>
    %29 = vector.broadcast %28 : vector<1x128xf32> to vector<8x128xf32>
    %30 = arith.addf %27, %29 : vector<8x128xf32>
    %31 = vector.extract_strided_slice %30 {offsets = [0, 0], sizes = [8, 1], strides = [1, 1]} : vector<8x128xf32> to vector<8x1xf32>
    %32 = vector.extract_strided_slice %30 {offsets = [0, 1], sizes = [8, 1], strides = [1, 1]} : vector<8x128xf32> to vector<8x1xf32>
    %33 = arith.maximumf %31, %32 : vector<8x1xf32>
    %34 = arith.subf %31, %33 : vector<8x1xf32>
    %35 = math.exp %34 : vector<8x1xf32>
    %36 = arith.subf %32, %33 : vector<8x1xf32>
    %37 = math.exp %36 : vector<8x1xf32>
    %38 = arith.addf %35, %37 : vector<8x1xf32>
    %39 = math.log %38 : vector<8x1xf32>
    %40 = arith.addf %33, %39 : vector<8x1xf32>
    %41 = vector.broadcast %40 : vector<8x1xf32> to vector<8x128xf32>
    %42 = arith.subf %30, %41 : vector<8x128xf32>
    %c0_23 = arith.constant 0 : index
    %c0_24 = arith.constant 0 : index
    %43 = vector.load %arg10[%c0_23, %c0_24] : memref<8x128xf32, #tpu.memory_space<vmem>>, vector<8x128xf32>
    tpu.vector_store %arg10[%c0_23, %c0_24], %42 {strides = array<i32>} : memref<8x128xf32, #tpu.memory_space<vmem>>, vector<8x128xf32>,
    return
  }
  func.func @transform_0(%arg0: i32) -> (i32, i32) {
    %c0_i32 = arith.constant 0 : i32
    %c0_i32_0 = arith.constant 0 : i32
    return %arg0, %c0_i32 : i32, i32
  }
  func.func @transform_1(%arg0: i32) -> (i32, i32) {
    %c0_i32 = arith.constant 0 : i32
    %c0_i32_0 = arith.constant 0 : i32
    %c0_i32_1 = arith.constant 0 : i32
    return %c0_i32, %c0_i32_0 : i32, i32
  }
  func.func @transform_2(%arg0: i32) -> (i32, i32) {
    %c0_i32 = arith.constant 0 : i32
    %c0_i32_0 = arith.constant 0 : i32
    %c0_i32_1 = arith.constant 0 : i32
    return %c0_i32, %c0_i32_0 : i32, i32
  }
  func.func @transform_3(%arg0: i32) -> (i32, i32) {
    %c0_i32 = arith.constant 0 : i32
    %c0_i32_0 = arith.constant 0 : i32
    %c0_i32_1 = arith.constant 0 : i32
    return %c0_i32, %c0_i32_0 : i32, i32
  }
  func.func @transform_4(%arg0: i32) -> (i32, i32) {
    %c0_i32 = arith.constant 0 : i32
    %c0_i32_0 = arith.constant 0 : i32
    %c0_i32_1 = arith.constant 0 : i32
    return %c0_i32, %c0_i32_0 : i32, i32
  }
  func.func @transform_5(%arg0: i32) -> (i32, i32) {
    %c0_i32 = arith.constant 0 : i32
    %c0_i32_0 = arith.constant 0 : i32
    %c0_i32_1 = arith.constant 0 : i32
    return %c0_i32, %c0_i32_0 : i32, i32
  }
  func.func @transform_6(%arg0: i32) -> (i32, i32) {
    %c0_i32 = arith.constant 0 : i32
    %c0_i32_0 = arith.constant 0 : i32
    %c0_i32_1 = arith.constant 0 : i32
    return %c0_i32, %c0_i32_0 : i32, i32
  }
  func.func @transform_7(%arg0: i32) -> (i32, i32) {
    %c0_i32 = arith.constant 0 : i32
    %c0_i32_0 = arith.constant 0 : i32
    %c0_i32_1 = arith.constant 0 : i32
    return %c0_i32, %c0_i32_0 : i32, i32
  }
  func.func @transform_8(%arg0: i32) -> (i32, i32) {
    %c0_i32 = arith.constant 0 : i32
    %c0_i32_0 = arith.constant 0 : i32
    %c0_i32_1 = arith.constant 0 : i32
    return %c0_i32, %c0_i32_0 : i32, i32
  }
  func.func @transform_9(%arg0: i32) -> (i32, i32) {
    %c0_i32 = arith.constant 0 : i32
    %c0_i32_0 = arith.constant 0 : i32
    return %arg0, %c0_i32 : i32, i32
  }
}

</mosaic_0001>

<bundles_post_ra>
// kernel: tpu_custom_call.1
= control target key start
LH: loop header
LB: loop body
LE: loop exit
PB: predicated region body
PF: predicated region fallthrough
CT: control target
= control target key end

     0   :  { %14 = vsyncpa [#allocation3], 0  ;;  %s840_s0 = inlined_call_operand.vmem [shape: f32[8,242], index: 0, kind: input, shape index: {}]   ;;  %s841_s1 = inlined_call_operand.hbm [shape: bf16[242,128], index: 1, kind: input, shape index: {}]   ;;  %s842_s2 = inlined_call_operand.vmem [shape: f32[1,128], index: 2, kind: input, shape index: {}]   ;;  %s843_s3 = inlined_call_operand.vmem [shape: bf16[128,32], index: 3, kind: input, shape index: {}]   ;;  %s844_s4 = inlined_call_operand.vmem [shape: f32[1,32], index: 4, kind: input, shape index: {}]   ;;  %s845_s5 = inlined_call_operand.vmem [shape: bf16[32,8], index: 5, kind: input, shape index: {}]   ;;  %s846_s6 = inlined_call_operand.vmem [shape: f32[1,8], index: 6, kind: input, shape index: {}]   ;;  %s847_s7 = inlined_call_operand.vmem [shape: bf16[8,128], index: 7, kind: input, shape index: {}]   ;;  %s848_s8 = inlined_call_operand.vmem [shape: f32[1,128], index: 8, kind: input, shape index: {}]   ;;  %s849_s9 = inlined_call_operand.hbm [shape: f32[8,128], index: 9, kind: output, shape index: {}]  }
   0x1   :  { %15 = vsyncpa [#allocation4], 0  ;;  %s707_s30 = smov [#allocation2]  }
   0x2   :  { %s23_s10 = sshll.u32 %s707_s30, 4  ;;  %s24_s10 = int_to_ptr.vmem [resolvable:$true] %s23_s10 }
   0x3   :  { %s671_s11 = scalar_lea.vmem %s24_s10, 1984  ;;  %p676_p1 = scmp.lt.s32.totalorder %s24_s10, %s24_s10 }
   0x4   :  { %p672_p0 = scmp.ne.s32.totalorder %s24_s10, %s671_s11  ;;  %p677_p2 = scmp.lt.s32.totalorder %s671_s11, %s671_s11 }
   0x6   :  { %p678_p3 = por %p677_p2, %p676_p1 }
   0x8   :  { %p679_p4 = pnand %p678_p3, %p672_p0 }
   0xa   :  { %682 = shalt.err (!%p679_p4)
}
   0xb   :  { %s708_s12 = smov 64   ;;  %s709_s13 = smov 4  }
   0xc   :  { %29 = dma.hbm_to_vmem [thread:$0]  %s841_s1, 1984, %s24_s10, [#allocation3], %s708_s12, %s708_s12, %s709_s13  }
   0xd   :  { %703 = dma.done.wait [#allocation3], 1984  }
   0xe   :  { %704 = vsyncadd [#allocation3], 4294965312  ;;  %v710_v0 = vmov 0.0   ;;  %vm187_vm0 = vcmask 1040384   ;;  %v632_v2 = vld [vmem:[#allocation2 + $0x38] sm:$0xff]   ;;  %v633_v3 = vld [vmem:[#allocation2 + $0x70] sm:$0xff]  }
   0xf   :  { %585 = vmatprep.subr.bf16.mxu1 %v710_v0  ;;  %v631_v1 = vld [vmem:[#allocation2 + $0x78] ss:$0 sps:$4 sm:$0x11]   ;;  %v634_v4 = vld [vmem:[#allocation2 + $0x30] sm:$0xff]   ;;  %v635_v5 = vld [vmem:[#allocation2 + $0x68] sm:$0xff]   ;;  %vm183_vm1 = vcmask 932864  }
  0x10   :  { %619 = vmatprep.subr.msk.bf16.mxu0 %vm187_vm0, %v631_v1  ;;  %v636_v6 = vld [vmem:[#allocation2 + $0x28] sm:$0xff]   ;;  %v637_v7 = vld [vmem:[#allocation2 + $0x60] sm:$0xff]   ;;  %v639_v9 = vld [vmem:[#allocation2 + $0x58] sm:$0xff]   ;;  %vm711_vm2 = vmmov 0   ;;  %vm427_vm3 = vcmask 1043456   ;;  %vm369_vm4 = vcmask 261120  }
  0x11   :  { %550 = vmatpush3.bf16.msra.mxu0 %v632_v2  ;;  %v638_v8 = vld [vmem:[#allocation2 + $0x20] sm:$0xff]   ;;  %v640_v10 = vld [vmem:[#allocation2 + $0x18] sm:$0xff]   ;;  %v49_v11 = vld [vmem:[%s840_s0 + $0x8] sm:$0xff]  ;;  %601 = vmatprep.mubr.msk.bf16.mxu1 %vm711_vm2, %v710_v0  ;;  %vm423_vm5 = vcmask 64512   ;;  %s712_s21 = smov 127  }
  0x12   :  { %551 = vmatprep.subr.bf16.mxu0 %v633_v3  ;;  %v641_v12 = vld [vmem:[#allocation2 + $0x50] sm:$0xff]   ;;  %v51_v13 = vpack.c.bf16 %v49_v11, %v49_v11  ;;  %v647_v14 = vld [vmem:[%s843_s3 + $0x38] sm:$0xff]   ;;  %v643_v17 = vld [vmem:[#allocation2 + $0x48] sm:$0xff]  }
  0x13   :  { %v642_v15 = vld [vmem:[#allocation2 + $0x10] sm:$0xff]   ;;  %586 = vmatpush3.bf16.msra.mxu1 %v647_v14  ;;  %v644_v18 = vld [vmem:[#allocation2 + $0x8] sm:$0xff]   ;;  %v645_v20 = vld [vmem:[#allocation2 + $0x40] sm:$0xff]  }
  0x14   :  { %533 = vmatprep.mubr.msk.bf16.mxu0 %vm183_vm1, %v51_v13  ;;  %v648_v16 = vld [vmem:[%s843_s3 + $0x30] sm:$0xff]   ;;  %587 = vmatprep.subr.bf16.mxu1 %v710_v0  ;;  %v649_v19 = vld [vmem:[%s843_s3 + $0x28] sm:$0xff]   ;;  %v646_v21 = vld [vmem:[#allocation2] sm:$0xff]  }
  0x15   :  { %552 = vmatpush3.bf16.msra.mxu0 %v634_v4  ;;  %v48_v22 = vld [vmem:[%s840_s0] sm:$0xff]  ;;  %v651_v25 = vld [vmem:[%s843_s3 + $0x18] sm:$0xff]   ;;  %v652_v26 = vld [vmem:[%s843_s3 + $0x10] sm:$0xff]  }
  0x16   :  { %553 = vmatprep.subr.bf16.mxu0 %v635_v5  ;;  %v650_v23 = vld [vmem:[%s843_s3 + $0x20] sm:$0xff]   ;;  %v50_v24 = vpack.c.bf16 %v48_v22, %v48_v22  ;;  %v653_v27 = vld [vmem:[%s843_s3 + $0x8] sm:$0xff]  }
  0x17   :  { %588 = vmatpush3.bf16.msra.mxu1 %v648_v16  ;;  %v654_v28 = vld [vmem:[%s843_s3] sm:$0xff]   ;;  %v655_v29 = vld [vmem:[%s845_s5 + $0x8] sm:$0xff]  }
  0x18   :  { %589 = vmatprep.subr.bf16.mxu1 %v710_v0  ;;  %v516_v31 = vld [vmem:[%s842_s2] ss:$0 sm:$0xff] }
  0x19   :  { %554 = vmatpush3.bf16.msra.mxu0 %v636_v6  ;;  %v656_v39 = vld [vmem:[%s845_s5] sm:$0xff]   ;;  %v714_v6 = vmov 0  }
  0x1a   :  { %555 = vmatprep.subr.bf16.mxu0 %v637_v7  ;;  %v415_v40 = vld [vmem:[%s847_s7] sm:$0xf]  ;;  %629 = vset.pattern.permute.xlu1 %v714_v6 }
  0x1b   :  { %590 = vmatpush3.bf16.msra.mxu1 %v649_v19  ;;  %v429_v41 = vsel %vm427_vm3, %v415_v40, 0  ;;  %v534_v42 = vld [vmem:[%s844_s4] ss:$0 sm:$0xff]  ;;  %630 = vset.pattern.permute.xlu0 %v714_v6 }
  0x1c   :  { %591 = vmatprep.subr.bf16.mxu1 %v710_v0  ;;  %v543_v50 = vld [vmem:[%s846_s6] ss:$0 sm:$0xff]  ;;  %s713_s6 = smov 1  }
  0x1d   :  { %556 = vmatpush3.bf16.msra.mxu0 %v638_v8  ;;  %v547_v58 = vld [vmem:[%s848_s8] ss:$0 sm:$0xff]  ;;  %s715_s8 = smov [#allocation5]  }
  0x1e   :  { %557 = vmatprep.subr.bf16.mxu0 %v639_v9  ;;  %s507_s22 = sshll.u32 %s715_s8, 4  ;;  %s508_s22 = int_to_ptr.vmem [resolvable:$true] %s507_s22 }
  0x1f   :  { %592 = vmatpush3.bf16.msra.mxu1 %v650_v23  ;;  %s683_s23 = scalar_lea.vmem %s508_s22, 128  ;;  %p688_p6 = scmp.lt.s32.totalorder %s508_s22, %s508_s22 }
  0x20   :  { %593 = vmatprep.subr.bf16.mxu1 %v710_v0  ;;  %p684_p5 = scmp.ne.s32.totalorder %s508_s22, %s683_s23  ;;  %p689_p7 = scmp.lt.s32.totalorder %s683_s23, %s683_s23 }
  0x21   :  { %558 = vmatpush3.bf16.msra.mxu0 %v640_v10 }
  0x22   :  { %559 = vmatprep.subr.bf16.mxu0 %v641_v12  ;;  %p690_p8 = por %p689_p7, %p688_p6 }
  0x23   :  { %594 = vmatpush3.bf16.msra.mxu1 %v651_v25 }
  0x24   :  { %595 = vmatprep.subr.bf16.mxu1 %v710_v0  ;;  %p691_p9 = pnand %p690_p8, %p684_p5 }
  0x25   :  { %560 = vmatpush3.bf16.msra.mxu0 %v642_v15 }
  0x26   :  { %561 = vmatprep.subr.bf16.mxu0 %v643_v17 }
  0x27   :  { %596 = vmatpush3.bf16.msra.mxu1 %v652_v26 }
  0x28   :  { %597 = vmatprep.subr.bf16.mxu1 %v710_v0 }
  0x29   :  { %562 = vmatpush3.bf16.msra.mxu0 %v644_v18 }
  0x2a   :  { %563 = vmatprep.subr.bf16.mxu0 %v645_v20 }
  0x2b   :  { %598 = vmatpush3.bf16.msra.mxu1 %v653_v27 }
  0x2c   :  { %599 = vmatprep.subr.bf16.mxu1 %v710_v0 }
  0x2d   :  { %564 = vmatpush3.bf16.msra.mxu0 %v646_v21 }
  0x2e   :  { %605 = vmatprep.subr.bf16.mxu0 %v710_v0 }
  0x2f   :  { %600 = vmatpush3.bf16.msra.mxu1 %v654_v28 }
  0x30   :  { %224 = vmatmul.mubr.bf16.vlgmr.msra.gmra.mxu0 %v50_v24  ;;  %613 = vmatprep.subr.bf16.mxu1 %v710_v0 }
  0x31   :  { %609 = vmatprep.mubr.msk.bf16.mxu0 %vm711_vm2, %v710_v0  ;;  %606 = vmatpush3.bf16.msra.mxu0 %v655_v29 }
  0x32   :  { %607 = vmatprep.subr.bf16.mxu0 %v710_v0 }
  0x35   :  { %608 = vmatpush3.bf16.msra.mxu0 %v656_v39 }
  0xf0   :  { %v565_v30 = vpop.f32.mrf.mxu0 }
  0xf2   :  { %v566_v32 = vpop.f32.mrf.mxu0 }
  0xf3   :  { %v567_v33 = vadd.f32 %v566_v32, %v565_v30 }
  0xf4   :  { %v568_v34 = vpop.f32.mrf.mxu0 }
  0xf5   :  { %v226_v35 = vadd.f32 %v567_v33, %v516_v31 }
  0xf6   :  { %v569_v36 = vpop.f32.mrf.mxu0 }
  0xf7   :  { %v231_v37 = vmax.f32 %v226_v35, 0.0 }
  0xf9   :  { %v232_v38 = vpack.c.bf16 %v231_v37, %v231_v37 }
  0xfb   :  { %602 = vmatmul.mubr.bf16.vlgmr.msra.gmra.mxu1 %v232_v38 }
  0xfc   :  { %615 = vmatprep.mubr.msk.bf16.mxu1 %vm711_vm2, %v710_v0  ;;  %614 = vmatpush3.bf16.msra.mxu1 %v429_v41 }
 0x1bb   :  { %v338_v43 = vpop.f32.mrf.mxu1 }
 0x1bc   :  { %v339_v44 = vadd.f32 %v534_v42, %v338_v43 }
 0x1bd   :  { %v603_v45 = vpop.f32.mrf.mxu1 }
 0x1be   :  { %v344_v46 = vmax.f32 %v339_v44, 0.0 }
 0x1bf   :  { %v341_v47 = vpop.f32.mrf.mxu1 }
 0x1c0   :  { %v345_v48 = vpack.c.bf16 %v344_v46, %v344_v46 }
 0x1c1   :  { %v604_v49 = vpop.f32.mrf.mxu1 }
 0x1c2   :  { %610 = vmatmul.mubr.msk.bf16.vlgmr.msra.gmra.mxu0 %vm369_vm4, %v345_v48 }
 0x282   :  { %v407_v51 = vpop.f32.mrf.mxu0 }
 0x283   :  { %v408_v52 = vadd.f32 %v543_v50, %v407_v51 }
 0x284   :  { %v611_v53 = vpop.f32.mrf.mxu0 }
 0x285   :  { %v413_v54 = vmax.f32 %v408_v52, 0.0 }
 0x286   :  { %v410_v55 = vpop.f32.mrf.mxu0 }
 0x287   :  { %v414_v56 = vpack.c.bf16 %v413_v54, %v413_v54 }
 0x288   :  { %v612_v57 = vpop.f32.mrf.mxu0 }
 0x289   :  { %616 = vmatmul.mubr.msk.bf16.vlgmr.msra.gmra.mxu1 %vm423_vm5, %v414_v56 }
 0x349   :  { %v465_v59 = vpop.f32.mrf.mxu1 }
 0x34a   :  { %v466_v60 = vadd.f32 %v547_v58, %v465_v59 }
 0x34b   :  { %v617_v61 = vpop.f32.mrf.mxu1 }
 0x34c   :  { %472 = vrot.lane.b32.xlu0 %v466_v60, %s712_s21 }
 0x34d   :  { %v468_v62 = vpop.f32.mrf.mxu1 }
 0x34f   :  { %v618_v63 = vpop.f32.mrf.mxu1 }
 0x3be   :  { %v473_v0 = vpop.permute.xlu0 %472 }
 0x3bf   :  { %v475_v1 = vmax.f32 %v466_v60, %v473_v0 }
 0x3c1   :  { %480 = vrot.lane.b32.xlu0 %v475_v1, %s713_s6  ;;  %v476_v7 = vsub.f32 %v466_v60, %v475_v1 }
 0x3c3   :  { %v477_v8 = vmul.f32 1.442695, %v476_v7 }
 0x433   :  { %v481_v2 = vpop.permute.xlu0 %480 }
 0x434   :  { %v483_v3 = vsub.f32 %v466_v60, %v481_v2 }
 0x436   :  { %v484_v4 = vmul.f32 1.442695, %v483_v3 }
 0x438   :  { %657 = vpow2.f32 %v484_v4 }
 0x439   :  { %659 = vpow2.f32 %v477_v8 }
 0x445   :  { %v658_v5 = vpop.eup %657 }
 0x446   :  { %487 = vrot.lane.b32.xlu1 %v658_v5, %s712_s21  ;;  %v660_v9 = vpop.eup %659 }
 0x4b8   :  { %v488_v10 = vpop.permute.xlu1 %487 }
 0x4b9   :  { %v490_v11 = vadd.f32 %v660_v9, %v488_v10 }
 0x4bb   :  { %661 = vlog2.f32 %v490_v11 }
 0x4c8   :  { %v662_v12 = vpop.eup %661 }
 0x4c9   :  { %v492_v13 = vmul.f32 0.6931472, %v662_v12 }
 0x4cb   :  { %v493_v14 = vadd.f32 %v492_v13, %v475_v1 }
 0x4cd   :  { %496 = vperm.xlu1 %629, %v493_v14  }
 0x548   :  { %v497_v15 = vpop.permute.xlu1 %496 }
 0x549   :  { %v499_v16 = vsub.f32 %v466_v60, %v497_v15 }
 0x54b   :  { %500 = vst [vmem:[#allocation5] sm:$0xff] %v499_v16 }
 0x54c   :  { %694 = shalt.err (!%p691_p9)
}
 0x54d   :  { %510 = dma.vmem_to_hbm [thread:$0]  %s508_s22, 128, %s849_s9, [#allocation4]  }
 0x54e   :  { %705 = dma.done.wait [#allocation4], 128  }
 0x54f   :  { %706 = vsyncadd [#allocation4], 4294967168 }
 0x550   :  { %514 = vsyncpa [#allocation3], 1 }
 0x551   :  { %515 = vsyncpa [#allocation4], 1 }

</bundles_post_ra>
